<compile_context>
chip_gen: v5e
topology: v5e:2x2
jax: 0.10.0
libtpu: 0.0.40
codegen_flags: <defaults>
</compile_context>

<pallas_src>
import jax
import jax.numpy as jnp
from jax.experimental import pallas as pl
from jax.experimental.pallas import tpu as pltpu


def _round_up(x, m):
    return (x + m - 1) // m * m


def _pick_batch_tile(batch):
    """Lane-aligned batch tile: big (<=2048) to amortize grid-step overhead, but with
    at least 2 grid steps whenever possible so v7x's two TensorCores both get work."""
    b128 = _round_up(max(batch, 1), 128)
    if b128 >= 256:
        return min(2048, _round_up(b128 // 2, 128))
    return b128  # 128


def _critic_mlp_kernel(xT_ref, w1t_ref, b1_ref, w2t_ref, b2_ref, w3r_ref, b3_ref,
                       o_ref):
    # ---- layer 1: (H0, K) @ (K, bt) -> (H0, bt), f32 accumulation on the MXU ----
    h = jnp.dot(w1t_ref[...], xT_ref[...], preferred_element_type=jnp.float32)
    h = jnp.maximum(h + b1_ref[...], 0.0)              # f32 bias + ReLU on the VPU

    # ---- layer 2: (H1, H0) @ (H0, bt) -> (H1, bt) ----
    h = jnp.dot(w2t_ref[...], h.astype(w2t_ref.dtype),
                preferred_element_type=jnp.float32)
    h = jnp.maximum(h + b2_ref[...], 0.0)

    # ---- layer 3: (1, H1) @ (H1, bt) -> (1, bt): lane-dense result & store ----
    q = jnp.dot(w3r_ref[...], h.astype(w3r_ref.dtype),
                preferred_element_type=jnp.float32)
    o_ref[...] = (q + b3_ref[0, 0]).astype(o_ref.dtype)    # b3 read from SMEM


def prepare_critic_params(params, compute_dtype=jnp.bfloat16):
    """One-time weight prep (hoist out of the per-step hot path).
    Weights are stored [in, out] (transpose of torch Linear.weight)."""
    w1, b1, w2, b2, w3, b3 = params
    w1t = w1.T.astype(compute_dtype)                    # (H0, K)
    w2t = w2.T.astype(compute_dtype)                    # (H1, H0)
    w3r = w3.reshape(-1)[None, :].astype(compute_dtype)  # (1, H1)
    b1c = b1.reshape(-1, 1).astype(jnp.float32)          # (H0, 1)
    b2c = b2.reshape(-1, 1).astype(jnp.float32)          # (H1, 1)
    b3s = b3.reshape(1, 1).astype(jnp.float32)           # (1, 1) scalar -> SMEM
    return (w1t, b1c, w2t, b2c, w3r, b3s)


def critic_forward(state, action, goal, prepared_params, *, batch_tile=None):
    """Pallas Critic forward.  `prepared_params` comes from prepare_critic_params().
    All matmul / bias / ReLU work runs inside one fused Pallas kernel; the wrapper only
    does the (tiny) concat/pad/transpose/cast of the activations and the final slice."""
    w1t, b1c, w2t, b2c, w3r, b3s = prepared_params
    compute_dtype = w1t.dtype

    B = state.shape[0]
    K = w1t.shape[1]
    H0 = w1t.shape[0]
    H1 = w2t.shape[0]
    assert state.shape[1] + action.shape[1] + goal.shape[1] == K

    if batch_tile is None:
        batch_tile = _pick_batch_tile(B)
    assert batch_tile % 128 == 0, "batch_tile must be a multiple of 128"
    B_pad = _round_up(B, batch_tile)
    grid = (B_pad // batch_tile,)

    # Fused concat + zero-pad + transpose + cast: one small XLA producer, gives the
    # kernel x^T with batch on the lane axis (K = 2*sd + ad is tiny, so this extra
    # pass over x is negligible next to the weight/activation streaming).
    x = jnp.concatenate([state, action, goal], axis=-1)          # (B, K)
    if B_pad != B:
        x = jnp.pad(x, ((0, B_pad - B), (0, 0)))
    xT = x.T.astype(compute_dtype)                               # (K, B_pad)

    full = lambda r, c: pl.BlockSpec((r, c), lambda i: (0, 0))   # grid-invariant block

    out = pl.pallas_call(
        _critic_mlp_kernel,
        out_shape=jax.ShapeDtypeStruct((1, B_pad), jnp.float32),
        grid_spec=pltpu.PrefetchScalarGridSpec(
            num_scalar_prefetch=0,
            grid=grid,
            in_specs=[
                pl.BlockSpec((K, batch_tile), lambda i: (0, i)),    # x^T batch tile
                full(H0, K),                                        # W1^T
                full(H0, 1),                                        # b1 column
                full(H1, H0),                                       # W2^T
                full(H1, 1),                                        # b2 column
                full(1, H1),                                        # w3 row
                pl.BlockSpec(memory_space=pltpu.MemorySpace.SMEM),  # b3 scalar
            ],
            # lane-dense output: batch on the lane axis, one dense (1, bt) block/step
            out_specs=pl.BlockSpec((1, batch_tile), lambda i: (0, i)),
        ),
        compiler_params=pltpu.CompilerParams(
            dimension_semantics=("parallel",),
            vmem_limit_bytes=32 * 1024 * 1024,
        ),
    )(xT, w1t, b1c, w2t, b2c, w3r, b3s)

    # layout plumbing back to the module's (B, 1) shape
    return out.reshape(B_pad, 1)[:B]


def init_critic_params(key, state_dim, action_dim, hidden_dims=(256, 256)):
    """PyTorch-Linear-style init: U(-1/sqrt(fan_in), 1/sqrt(fan_in)).
    Weights stored [in, out] (transpose of torch Linear.weight)."""
    dims = [2 * state_dim + action_dim] + list(hidden_dims) + [1]
    params = []
    for fan_in, fan_out in zip(dims[:-1], dims[1:]):
        key, kw, kb = jax.random.split(key, 3)
        bound = 1.0 / jnp.sqrt(jnp.float32(fan_in))
        w = jax.random.uniform(kw, (fan_in, fan_out), jnp.float32, -bound, bound)
        b = jax.random.uniform(kb, (1, fan_out), jnp.float32, -bound, bound)
        params += [w, b]
    return tuple(params)


def critic_reference(state, action, goal, params):
    """Pure-JAX reference for checking the kernel."""
    w1, b1, w2, b2, w3, b3 = params
    x = jnp.concatenate([state, action, goal], axis=-1)
    x = jnp.maximum(x @ w1 + b1, 0.0)
    x = jnp.maximum(x @ w2 + b2, 0.0)
    return x @ w3 + b3


if __name__ == "__main__":
    # Small shapes consistent with the module (hidden dims = module default [256, 256]).
    batch = 8
    state_dim = 16
    action_dim = 8
    hidden_dims = (256, 256)

    key = jax.random.PRNGKey(0)
    k_s, k_a, k_g, k_p = jax.random.split(key, 4)

    state = jax.random.normal(k_s, (batch, state_dim), jnp.float32)
    action = jax.random.normal(k_a, (batch, action_dim), jnp.float32)
    goal = jax.random.normal(k_g, (batch, state_dim), jnp.float32)
    params = init_critic_params(k_p, state_dim, action_dim, hidden_dims)

    q_ref = critic_reference(state, action, goal, params)

    # f32 operand path: tight check against the pure-JAX reference.
    prep_f32 = prepare_critic_params(params, compute_dtype=jnp.float32)
    q_f32 = jax.block_until_ready(critic_forward(state, action, goal, prep_f32))
    assert q_f32.shape == (batch, 1)
    assert jnp.allclose(q_f32, q_ref, atol=1e-3, rtol=1e-3), "f32 kernel mismatch"

    # Default path: bf16 MXU operands (all generations), f32 accumulation: loose check.
    # Note: inputs as well as weights are cast to bf16, hence the looser tolerance.
    prep_bf16 = prepare_critic_params(params)
    q_bf16 = jax.block_until_ready(critic_forward(state, action, goal, prep_bf16))
    assert q_bf16.shape == (batch, 1)
    assert jnp.allclose(q_bf16, q_ref, atol=1e-1, rtol=1e-1), "bf16 kernel mismatch"

    print("KERNEL_OK")
</pallas_src>

<mosaic_0001>
module attributes {stable_mosaic.version = 11 : i64} {
  func.func @_critic_mlp_kernel(%arg0: i32, %arg1: memref<40x128xf32, #tpu.memory_space<vmem>>, %arg2: memref<256x40xf32, #tpu.memory_space<vmem>>, %arg3: memref<256x1xf32, #tpu.memory_space<vmem>>, %arg4: memref<256x256xf32, #tpu.memory_space<vmem>>, %arg5: memref<256x1xf32, #tpu.memory_space<vmem>>, %arg6: memref<1x256xf32, #tpu.memory_space<vmem>>, %arg7: memref<1x1xf32, #tpu.memory_space<smem>>, %arg8: memref<1x128xf32, #tpu.memory_space<vmem>>) attributes {dimension_semantics = [#tpu.dimension_semantics<parallel>], iteration_bounds = array<i64: 1>, scalar_prefetch = 0 : i64, scratch_operands = 0 : i64, tpu.core_type = #tpu.core_type<tc>, window_params = [{transform_indices = @transform_0, window_bounds = array<i64: 40, 128>}, {pipeline_mode = #tpu.pipeline_mode<synchronous>, transform_indices = @transform_1, window_bounds = array<i64: 256, 40>}, {pipeline_mode = #tpu.pipeline_mode<synchronous>, transform_indices = @transform_2, window_bounds = array<i64: 256, 1>}, {pipeline_mode = #tpu.pipeline_mode<synchronous>, transform_indices = @transform_3, window_bounds = array<i64: 256, 256>}, {pipeline_mode = #tpu.pipeline_mode<synchronous>, transform_indices = @transform_4, window_bounds = array<i64: 256, 1>}, {pipeline_mode = #tpu.pipeline_mode<synchronous>, transform_indices = @transform_5, window_bounds = array<i64: 1, 256>}, {transform_indices = @transform_6, window_bounds = array<i64: 1, 1>}, {transform_indices = @transform_7, window_bounds = array<i64: 1, 128>}]} {
    %c0 = arith.constant 0 : index
    %c0_0 = arith.constant 0 : index
    %0 = vector.load %arg2[%c0, %c0_0] : memref<256x40xf32, #tpu.memory_space<vmem>>, vector<256x40xf32>
    %c0_1 = arith.constant 0 : index
    %c0_2 = arith.constant 0 : index
    %1 = vector.load %arg1[%c0_1, %c0_2] : memref<40x128xf32, #tpu.memory_space<vmem>>, vector<40x128xf32>
    %cst = arith.constant dense<0.000000e+00> : vector<256x128xf32>
    %2 = tpu.matmul %0, %1, %cst {dimension_numbers = #tpu.dot_dimension_numbers<[1], [0], [0], [1], [0, 0, 1, 1], [], []>} : vector<256x40xf32>, vector<40x128xf32>, vector<256x128xf32> -> vector<256x128xf32>
    %c0_3 = arith.constant 0 : index
    %c0_4 = arith.constant 0 : index
    %3 = vector.load %arg3[%c0_3, %c0_4] : memref<256x1xf32, #tpu.memory_space<vmem>>, vector<256x1xf32>
    %4 = vector.broadcast %3 : vector<256x1xf32> to vector<256x128xf32>
    %5 = arith.addf %2, %4 : vector<256x128xf32>
    %cst_5 = arith.constant 0.000000e+00 : f32
    %6 = vector.broadcast %cst_5 : f32 to vector<256x128xf32>
    %7 = arith.maximumf %5, %6 : vector<256x128xf32>
    %c0_6 = arith.constant 0 : index
    %c0_7 = arith.constant 0 : index
    %8 = vector.load %arg4[%c0_6, %c0_7] : memref<256x256xf32, #tpu.memory_space<vmem>>, vector<256x256xf32>
    %cst_8 = arith.constant dense<0.000000e+00> : vector<256x128xf32>
    %9 = tpu.matmul %8, %7, %cst_8 {dimension_numbers = #tpu.dot_dimension_numbers<[1], [0], [0], [1], [0, 0, 1, 1], [], []>} : vector<256x256xf32>, vector<256x128xf32>, vector<256x128xf32> -> vector<256x128xf32>
    %c0_9 = arith.constant 0 : index
    %c0_10 = arith.constant 0 : index
    %10 = vector.load %arg5[%c0_9, %c0_10] : memref<256x1xf32, #tpu.memory_space<vmem>>, vector<256x1xf32>
    %11 = vector.broadcast %10 : vector<256x1xf32> to vector<256x128xf32>
    %12 = arith.addf %9, %11 : vector<256x128xf32>
    %cst_11 = arith.constant 0.000000e+00 : f32
    %13 = vector.broadcast %cst_11 : f32 to vector<256x128xf32>
    %14 = arith.maximumf %12, %13 : vector<256x128xf32>
    %c0_12 = arith.constant 0 : index
    %c0_13 = arith.constant 0 : index
    %15 = vector.load %arg6[%c0_12, %c0_13] : memref<1x256xf32, #tpu.memory_space<vmem>>, vector<1x256xf32>
    %cst_14 = arith.constant dense<0.000000e+00> : vector<1x128xf32>
    %16 = tpu.matmul %15, %14, %cst_14 {dimension_numbers = #tpu.dot_dimension_numbers<[1], [0], [0], [1], [0, 0, 1, 1], [], []>} : vector<1x256xf32>, vector<256x128xf32>, vector<1x128xf32> -> vector<1x128xf32>
    %c0_15 = arith.constant 0 : index
    %c0_16 = arith.constant 0 : index
    %17 = memref.load %arg7[%c0_15, %c0_16] : memref<1x1xf32, #tpu.memory_space<smem>>
    %18 = vector.broadcast %17 : f32 to vector<1x128xf32>
    %19 = arith.addf %16, %18 : vector<1x128xf32>
    %c0_17 = arith.constant 0 : index
    %c0_18 = arith.constant 0 : index
    %20 = vector.load %arg8[%c0_17, %c0_18] : memref<1x128xf32, #tpu.memory_space<vmem>>, vector<1x128xf32>
    tpu.vector_store %arg8[%c0_17, %c0_18], %19 {strides = array<i32>} : memref<1x128xf32, #tpu.memory_space<vmem>>, vector<1x128xf32>,
    return
  }
  func.func @transform_0(%arg0: i32) -> (i32, i32) {
    %c0_i32 = arith.constant 0 : i32
    %c0_i32_0 = arith.constant 0 : i32
    return %c0_i32, %arg0 : i32, i32
  }
  func.func @transform_1(%arg0: i32) -> (i32, i32) {
    %c0_i32 = arith.constant 0 : i32
    %c0_i32_0 = arith.constant 0 : i32
    %c0_i32_1 = arith.constant 0 : i32
    return %c0_i32, %c0_i32_0 : i32, i32
  }
  func.func @transform_2(%arg0: i32) -> (i32, i32) {
    %c0_i32 = arith.constant 0 : i32
    %c0_i32_0 = arith.constant 0 : i32
    %c0_i32_1 = arith.constant 0 : i32
    return %c0_i32, %c0_i32_0 : i32, i32
  }
  func.func @transform_3(%arg0: i32) -> (i32, i32) {
    %c0_i32 = arith.constant 0 : i32
    %c0_i32_0 = arith.constant 0 : i32
    %c0_i32_1 = arith.constant 0 : i32
    return %c0_i32, %c0_i32_0 : i32, i32
  }
  func.func @transform_4(%arg0: i32) -> (i32, i32) {
    %c0_i32 = arith.constant 0 : i32
    %c0_i32_0 = arith.constant 0 : i32
    %c0_i32_1 = arith.constant 0 : i32
    return %c0_i32, %c0_i32_0 : i32, i32
  }
  func.func @transform_5(%arg0: i32) -> (i32, i32) {
    %c0_i32 = arith.constant 0 : i32
    %c0_i32_0 = arith.constant 0 : i32
    %c0_i32_1 = arith.constant 0 : i32
    return %c0_i32, %c0_i32_0 : i32, i32
  }
  func.func @transform_6(%arg0: i32) -> (i32, i32) {
    %c0_i32 = arith.constant 0 : i32
    %c0_i32_0 = arith.constant 0 : i32
    %c0_i32_1 = arith.constant 0 : i32
    return %c0_i32, %c0_i32_0 : i32, i32
  }
  func.func @transform_7(%arg0: i32) -> (i32, i32) {
    %c0_i32 = arith.constant 0 : i32
    %c0_i32_0 = arith.constant 0 : i32
    return %c0_i32, %arg0 : i32, i32
  }
}

</mosaic_0001>

<bundles_post_ra>
// kernel: tpu_custom_call.1
= control target key start
LH: loop header
LB: loop body
LE: loop exit
PB: predicated region body
PF: predicated region fallthrough
CT: control target
= control target key end

     0   :  { %v1178_v3 = vmov 0   ;;  %vm257_vm0 = vcmask 326656   ;;  %s2010_s0 = inlined_call_operand.vmem [shape: f32[40,128], index: 0, kind: input, shape index: {}]   ;;  %s2011_s1 = inlined_call_operand.vmem [shape: f32[256,40], index: 1, kind: input, shape index: {}]   ;;  %s2012_s2 = inlined_call_operand.vmem [shape: f32[256,1], index: 2, kind: input, shape index: {}]   ;;  %s2013_s3 = inlined_call_operand.vmem [shape: f32[256,256], index: 3, kind: input, shape index: {}]   ;;  %s2014_s4 = inlined_call_operand.vmem [shape: f32[256,1], index: 4, kind: input, shape index: {}]   ;;  %s2015_s5 = inlined_call_operand.vmem [shape: f32[1,256], index: 5, kind: input, shape index: {}]   ;;  %s2016_s6 = inlined_call_operand.<no memory space> [shape: f32[1,1], index: 6, kind: input, shape index: {}]   ;;  %s2017_s7 = inlined_call_operand.hbm [shape: f32[1,128], index: 7, kind: output, shape index: {}]  }
   0x1   :  { %v64_v0 = vld [vmem:[%s2010_s0 + $0x20] sm:$0xff]  ;;  %v96_v1 = vld [vmem:[%s2012_s2 + $0xf8] sm:$0xff]  ;;  %1150 = vset.pattern.permute.xlu1 %v1178_v3  ;;  %1149 = vset.pattern.permute.xlu0 %v1178_v3  ;;  %v79_v5 = vld [vmem:[%s2012_s2 + $0x70] sm:$0xff] }
   0x2   :  { %v80_v2 = vld [vmem:[%s2012_s2 + $0x78] sm:$0xff]  ;;  %365 = vmatpush.msra.mxu0 %v64_v0  ;;  %254 = vperm.xlu0 %1149, %v96_v1   ;;  %v62_v6 = vld [vmem:[%s2010_s0 + $0x10] sm:$0xff]  ;;  %v61_v7 = vld [vmem:[%s2010_s0 + $0x8] sm:$0xff] }
   0x3   :  { %v63_v4 = vld [vmem:[%s2010_s0 + $0x18] sm:$0xff]  ;;  %174 = vperm.xlu1 %1150, %v80_v2   ;;  %1151 = vset.pattern.permute.xlu2 %v1178_v3  ;;  %v60_v8 = vld [vmem:[%s2010_s0] sm:$0xff]  ;;  %v95_v9 = vld [vmem:[%s2012_s2 + $0xf0] sm:$0xff] }
   0x4   :  { %366 = vmatpush.msra.mxu0 %v63_v4  ;;  %169 = vperm.xlu2 %1151, %v79_v5   ;;  %v94_v10 = vld [vmem:[%s2012_s2 + $0xe8] sm:$0xff]  ;;  %v28_v11 = vld [vmem:[%s2011_s1] sm:$0xff] }
   0x5   :  { %1110 = vmatpush.msra.mxu3 %v64_v0 }
   0x6   :  { %367 = vmatpush.msra.mxu0 %v62_v6 }
   0x7   :  { %1111 = vmatpush.msra.mxu3 %v63_v4 }
   0x8   :  { %368 = vmatpush.msra.mxu0 %v61_v7 }
   0x9   :  { %13 = vsyncpa [#allocation4], 0  ;;  %v93_v12 = vld [vmem:[%s2012_s2 + $0xe0] sm:$0xff]  ;;  %1112 = vmatpush.msra.mxu3 %v62_v6  ;;  %v78_v13 = vld [vmem:[%s2012_s2 + $0x68] sm:$0xff]  ;;  %s1179_s0 = smov [#allocation3]   ;;  %s1069_s27 = sshll.u32 %s2017_s7, 4  ;;  %s1070_s27 = int_to_ptr.hbm [resolvable:$true] %s1069_s27 }
   0xa   :  { %369 = vmatpush.msra.mxu0 %v60_v8  ;;  %249 = vperm.xlu0 %1149, %v95_v9   ;;  %v92_v14 = vld [vmem:[%s2012_s2 + $0xd8] sm:$0xff]  ;;  %v29_v15 = vld [vmem:[%s2011_s1 + $0x8] sm:$0xff]  ;;  %v77_v16 = vld [vmem:[%s2012_s2 + $0x60] sm:$0xff]  ;;  %s1067_s25 = sshll.u32 %s1179_s0, 4  ;;  %s1068_s25 = int_to_ptr.vmem [resolvable:$true] %s1067_s25 }
   0xb   :  { %244 = vperm.xlu1 %1150, %v94_v10   ;;  %1078 = vmatmul.msk.f32.vlgmr.msra.gmra.mxu0 %vm257_vm0, %v28_v11  ;;  %v91_v17 = vld [vmem:[%s2012_s2 + $0xd0] sm:$0xff]  ;;  %v76_v18 = vld [vmem:[%s2012_s2 + $0x58] sm:$0xff]  ;;  %v90_v20 = vld [vmem:[%s2012_s2 + $0xc8] sm:$0xff] }
   0xc   :  { %239 = vperm.xlu2 %1151, %v93_v12   ;;  %1113 = vmatpush.msra.mxu3 %v61_v7  ;;  %v30_v19 = vld [vmem:[%s2011_s1 + $0x10] sm:$0xff]  ;;  %v89_v22 = vld [vmem:[%s2012_s2 + $0xc0] sm:$0xff]  ;;  %v31_v23 = vld [vmem:[%s2011_s1 + $0x18] sm:$0xff] }
   0xd   :  { %v75_v21 = vld [vmem:[%s2012_s2 + $0x50] sm:$0xff]  ;;  %v74_v24 = vld [vmem:[%s2012_s2 + $0x48] sm:$0xff]  ;;  %v88_v25 = vld [vmem:[%s2012_s2 + $0xb8] sm:$0xff] }
   0xe   :  { %1114 = vmatpush.msra.mxu3 %v60_v8  ;;  %v73_v26 = vld [vmem:[%s2012_s2 + $0x40] sm:$0xff]  ;;  %v87_v28 = vld [vmem:[%s2012_s2 + $0xb0] sm:$0xff]  ;;  %v72_v29 = vld [vmem:[%s2012_s2 + $0x38] sm:$0xff] }
   0xf   :  { %v32_v27 = vld [vmem:[%s2011_s1 + $0x20] sm:$0xff]  ;;  %v86_v30 = vld [vmem:[%s2012_s2 + $0xa8] sm:$0xff]  ;;  %v71_v32 = vld [vmem:[%s2012_s2 + $0x30] sm:$0xff] }
  0x10   :  { %v33_v31 = vld [vmem:[%s2011_s1 + $0x28] sm:$0xff]  ;;  %v85_v33 = vld [vmem:[%s2012_s2 + $0xa0] sm:$0xff]  ;;  %v34_v35 = vld [vmem:[%s2011_s1 + $0x30] sm:$0xff] }
  0x11   :  { %v70_v34 = vld [vmem:[%s2012_s2 + $0x28] sm:$0xff]  ;;  %v84_v36 = vld [vmem:[%s2012_s2 + $0x98] sm:$0xff]  ;;  %v69_v37 = vld [vmem:[%s2012_s2 + $0x20] sm:$0xff] }
  0x12   :  { %164 = vperm.xlu0 %1149, %v78_v13   ;;  %v83_v38 = vld [vmem:[%s2012_s2 + $0x90] sm:$0xff]  ;;  %v35_v39 = vld [vmem:[%s2011_s1 + $0x38] sm:$0xff]  ;;  %v82_v41 = vld [vmem:[%s2012_s2 + $0x88] sm:$0xff] }
  0x13   :  { %234 = vperm.xlu1 %1150, %v92_v14   ;;  %1079 = vmatmul.msk.f32.gmra.mxu0 %vm257_vm0, %v29_v15  ;;  %v68_v40 = vld [vmem:[%s2012_s2 + $0x18] sm:$0xff]  ;;  %v67_v42 = vld [vmem:[%s2012_s2 + $0x10] sm:$0xff]  ;;  %v36_v43 = vld [vmem:[%s2011_s1 + $0x40] sm:$0xff] }
  0x14   :  { %159 = vperm.xlu2 %1151, %v77_v16   ;;  %v81_v44 = vld [vmem:[%s2012_s2 + $0x80] sm:$0xff]  ;;  %v66_v45 = vld [vmem:[%s2012_s2 + $0x8] sm:$0xff]  ;;  %v55_v48 = vld [vmem:[%s2011_s1 + $0xd8] sm:$0xff] }
  0x15   :  { %v65_v46 = vld [vmem:[%s2012_s2] sm:$0xff]  ;;  %v37_v47 = vld [vmem:[%s2011_s1 + $0x48] sm:$0xff]  ;;  %1105 = vmatmul.msk.f32.vlgmr.msra.gmra.mxu3 %vm257_vm0, %v55_v48  ;;  %v578_v49 = vld [vmem:[%s2014_s4 + $0x78] sm:$0xff] }
  0x16   :  { %v577_v50 = vld [vmem:[%s2014_s4 + $0x70] sm:$0xff]  ;;  %v576_v52 = vld [vmem:[%s2014_s4 + $0x68] sm:$0xff]  ;;  %v56_v53 = vld [vmem:[%s2011_s1 + $0xe0] sm:$0xff] }
  0x17   :  { %v38_v51 = vld [vmem:[%s2011_s1 + $0x50] sm:$0xff]  ;;  %v575_v54 = vld [vmem:[%s2014_s4 + $0x60] sm:$0xff]  ;;  %v574_v55 = vld [vmem:[%s2014_s4 + $0x58] sm:$0xff] }
  0x18   :  { %v39_v56 = vld [vmem:[%s2011_s1 + $0x58] sm:$0xff]  ;;  %v57_v58 = vld [vmem:[%s2011_s1 + $0xe8] sm:$0xff]  ;;  %v593_v59 = vld [vmem:[%s2014_s4 + $0xf0] sm:$0xff] }
  0x19   :  { %v594_v57 = vld [vmem:[%s2014_s4 + $0xf8] sm:$0xff]  ;;  %v40_v60 = vld [vmem:[%s2011_s1 + $0x60] sm:$0xff]  ;;  %v572_v61 = vld [vmem:[%s2014_s4 + $0x48] sm:$0xff] }
  0x1a   :  { %229 = vperm.xlu0 %1149, %v91_v17   ;;  %v573_v62 = vld [vmem:[%s2014_s4 + $0x50] sm:$0xff]  ;;  %v571_v0 = vld [vmem:[%s2014_s4 + $0x40] sm:$0xff]  ;;  %v41_v1 = vld [vmem:[%s2011_s1 + $0x68] sm:$0xff] }
  0x1b   :  { %154 = vperm.xlu1 %1150, %v76_v18   ;;  %1080 = vmatmul.msk.f32.gmra.mxu0 %vm257_vm0, %v30_v19  ;;  %v58_v63 = vld [vmem:[%s2011_s1 + $0xf0] sm:$0xff]  ;;  %v591_v2 = vld [vmem:[%s2014_s4 + $0xe0] sm:$0xff]  ;;  %v592_v3 = vld [vmem:[%s2014_s4 + $0xe8] sm:$0xff] }
  0x1c   :  { %224 = vperm.xlu2 %1151, %v90_v20   ;;  %v59_v4 = vld [vmem:[%s2011_s1 + $0xf8] sm:$0xff]  ;;  %v42_v6 = vld [vmem:[%s2011_s1 + $0x70] sm:$0xff]  ;;  %v568_v9 = vld [vmem:[%s2014_s4 + $0x28] sm:$0xff] }
  0x1d   :  { %1106 = vmatmul.msk.f32.gmra.mxu3 %vm257_vm0, %v56_v53  ;;  %v590_v5 = vld [vmem:[%s2014_s4 + $0xd8] sm:$0xff]  ;;  %v569_v7 = vld [vmem:[%s2014_s4 + $0x30] sm:$0xff]  ;;  %v588_v11 = vld [vmem:[%s2014_s4 + $0xc8] sm:$0xff] }
  0x1e   :  { %v570_v8 = vld [vmem:[%s2014_s4 + $0x38] sm:$0xff]  ;;  %v589_v12 = vld [vmem:[%s2014_s4 + $0xd0] sm:$0xff]  ;;  %v587_v13 = vld [vmem:[%s2014_s4 + $0xc0] sm:$0xff] }
  0x1f   :  { %v43_v10 = vld [vmem:[%s2011_s1 + $0x78] sm:$0xff]  ;;  %v44_v15 = vld [vmem:[%s2011_s1 + $0x80] sm:$0xff]  ;;  %v565_v18 = vld [vmem:[%s2014_s4 + $0x10] sm:$0xff] }
  0x20   :  { %v566_v16 = vld [vmem:[%s2014_s4 + $0x18] sm:$0xff]  ;;  %v567_v17 = vld [vmem:[%s2014_s4 + $0x20] sm:$0xff]  ;;  %v45_v20 = vld [vmem:[%s2011_s1 + $0x88] sm:$0xff] }
  0x22   :  { %149 = vperm.xlu0 %1149, %v75_v21   ;;  %v585_v21 = vld [vmem:[%s2014_s4 + $0xb0] sm:$0xff] }
  0x23   :  { %219 = vperm.xlu1 %1150, %v89_v22   ;;  %1081 = vmatmul.msk.f32.gmra.mxu0 %vm257_vm0, %v31_v23  ;;  %v586_v22 = vld [vmem:[%s2014_s4 + $0xb8] sm:$0xff]  ;;  %v584_v23 = vld [vmem:[%s2014_s4 + $0xa8] sm:$0xff] }
  0x24   :  { %144 = vperm.xlu2 %1151, %v74_v24  }
  0x25   :  { %1107 = vmatmul.msk.f32.gmra.mxu3 %vm257_vm0, %v57_v58 }
  0x2a   :  { %214 = vperm.xlu0 %1149, %v88_v25   ;;  %v46_v25 = vld [vmem:[%s2011_s1 + $0x90] sm:$0xff] }
  0x2b   :  { %139 = vperm.xlu1 %1150, %v73_v26   ;;  %1082 = vmatmul.msk.f32.gmra.mxu0 %vm257_vm0, %v32_v27  ;;  %v563_v26 = vld [vmem:[%s2014_s4] sm:$0xff]  ;;  %v564_v27 = vld [vmem:[%s2014_s4 + $0x8] sm:$0xff] }
  0x2c   :  { %209 = vperm.xlu2 %1151, %v87_v28   ;;  %v582_v28 = vld [vmem:[%s2014_s4 + $0x98] sm:$0xff] }
  0x2d   :  { %1108 = vmatmul.msk.f32.gmra.mxu3 %vm257_vm0, %v58_v63 }
  0x32   :  { %134 = vperm.xlu0 %1149, %v72_v29  }
  0x33   :  { %204 = vperm.xlu1 %1150, %v86_v30   ;;  %1083 = vmatmul.msk.f32.gmra.mxu0 %vm257_vm0, %v33_v31  ;;  %v47_v30 = vld [vmem:[%s2011_s1 + $0x98] sm:$0xff]  ;;  %v581_v31 = vld [vmem:[%s2014_s4 + $0x90] sm:$0xff] }
  0x34   :  { %129 = vperm.xlu2 %1151, %v71_v32   ;;  %v583_v32 = vld [vmem:[%s2014_s4 + $0xa0] sm:$0xff] }
  0x35   :  { %1109 = vmatmul.msk.f32.gmra.mxu3 %vm257_vm0, %v59_v4 }
  0x3a   :  { %199 = vperm.xlu0 %1149, %v85_v33   ;;  %v579_v33 = vld [vmem:[%s2014_s4 + $0x80] sm:$0xff] }
  0x3b   :  { %124 = vperm.xlu1 %1150, %v70_v34   ;;  %1084 = vmatmul.msk.f32.gmra.mxu0 %vm257_vm0, %v34_v35  ;;  %v48_v35 = vld [vmem:[%s2011_s1 + $0xa0] sm:$0xff] }
  0x3c   :  { %194 = vperm.xlu2 %1151, %v84_v36   ;;  %v580_v36 = vld [vmem:[%s2014_s4 + $0x88] sm:$0xff] }
  0x42   :  { %119 = vperm.xlu0 %1149, %v69_v37  }
  0x43   :  { %189 = vperm.xlu1 %1150, %v83_v38   ;;  %1085 = vmatmul.msk.f32.gmra.mxu0 %vm257_vm0, %v35_v39  ;;  %v49_v38 = vld [vmem:[%s2011_s1 + $0xa8] sm:$0xff] }
  0x44   :  { %114 = vperm.xlu2 %1151, %v68_v40  }
  0x4a   :  { %184 = vperm.xlu0 %1149, %v82_v41  }
  0x4b   :  { %109 = vperm.xlu1 %1150, %v67_v42   ;;  %1086 = vmatmul.msk.f32.gmra.mxu0 %vm257_vm0, %v36_v43  ;;  %v50_v42 = vld [vmem:[%s2011_s1 + $0xb0] sm:$0xff] }
  0x4c   :  { %179 = vperm.xlu2 %1151, %v81_v44  }
  0x52   :  { %104 = vperm.xlu0 %1149, %v66_v45  }
  0x53   :  { %99 = vperm.xlu1 %1150, %v65_v46   ;;  %1087 = vmatmul.msk.f32.gmra.mxu0 %vm257_vm0, %v37_v47  ;;  %v51_v46 = vld [vmem:[%s2011_s1 + $0xb8] sm:$0xff] }
  0x54   :  { %672 = vperm.xlu2 %1151, %v578_v49  }
  0x5a   :  { %667 = vperm.xlu0 %1149, %v577_v50   ;;  %v52_v50 = vld [vmem:[%s2011_s1 + $0xc0] sm:$0xff] }
  0x5b   :  { %1088 = vmatmul.msk.f32.gmra.mxu0 %vm257_vm0, %v38_v51  ;;  %662 = vperm.xlu1 %1150, %v576_v52  }
  0x5c   :  { %657 = vperm.xlu2 %1151, %v575_v54   ;;  %v53_v54 = vld [vmem:[%s2011_s1 + $0xc8] sm:$0xff] }
  0x5e   :  { %v170_v47 = vpop.permute.xlu2 %169 }
  0x62   :  { %652 = vperm.xlu0 %1149, %v574_v55  }
  0x63   :  { %1089 = vmatmul.msk.f32.gmra.mxu0 %vm257_vm0, %v39_v56  ;;  %752 = vperm.xlu1 %1150, %v594_v57  }
  0x64   :  { %647 = vperm.xlu2 %1151, %v573_v62  }
  0x66   :  { %v240_v52 = vpop.permute.xlu2 %239 }
  0x6a   :  { %747 = vperm.xlu0 %1149, %v593_v59   ;;  %v54_v59 = vld [vmem:[%s2011_s1 + $0xd0] sm:$0xff] }
  0x6b   :  { %1090 = vmatmul.msk.f32.gmra.mxu0 %vm257_vm0, %v40_v60  ;;  %642 = vperm.xlu1 %1150, %v572_v61  }
  0x6c   :  { %742 = vperm.xlu2 %1151, %v592_v3  }
  0x6e   :  { %v160_v57 = vpop.permute.xlu2 %159 }
  0x72   :  { %637 = vperm.xlu0 %1149, %v571_v0  }
  0x73   :  { %1091 = vmatmul.msk.f32.gmra.mxu0 %vm257_vm0, %v41_v1  ;;  %737 = vperm.xlu1 %1150, %v591_v2  }
  0x74   :  { %632 = vperm.xlu2 %1151, %v570_v8   ;;  %v255_v39 = vpop.permute.xlu0 %254 }
  0x75   :  { %v175_v40 = vpop.permute.xlu1 %174 }
  0x76   :  { %v1579_v1 = vpop.permute.xlu2 %224 }
  0x7a   :  { %732 = vperm.xlu0 %1149, %v590_v5  }
  0x7b   :  { %1092 = vmatmul.msk.f32.gmra.mxu0 %vm257_vm0, %v42_v6  ;;  %627 = vperm.xlu1 %1150, %v569_v7  }
  0x7c   :  { %727 = vperm.xlu2 %1151, %v589_v12   ;;  %v250_v43 = vpop.permute.xlu0 %249 }
  0x7d   :  { %v245_v44 = vpop.permute.xlu1 %244 }
  0x7e   :  { %v145_v6 = vpop.permute.xlu2 %144 }
  0x82   :  { %622 = vperm.xlu0 %1149, %v568_v9  }
  0x83   :  { %1093 = vmatmul.msk.f32.gmra.mxu0 %vm257_vm0, %v43_v10  ;;  %722 = vperm.xlu1 %1150, %v588_v11  }
  0x84   :  { %617 = vperm.xlu2 %1151, %v567_v17   ;;  %v165_v48 = vpop.permute.xlu0 %164 }
  0x85   :  { %v235_v51 = vpop.permute.xlu1 %234 }
  0x86   :  { %v1585_v11 = vpop.permute.xlu2 %209 }
  0x88   :  { %v1472_v14 = vpop.f32.mrf.mxu0 }
  0x8a   :  { %717 = vperm.xlu0 %1149, %v587_v13  }
  0x8b   :  { %1094 = vmatmul.msk.f32.gmra.mxu0 %vm257_vm0, %v44_v15  ;;  %612 = vperm.xlu1 %1150, %v566_v16  }
  0x8c   :  { %712 = vperm.xlu2 %1151, %v586_v22   ;;  %v1570_v55 = vpop.permute.xlu0 %229 }
  0x8d   :  { %v155_v56 = vpop.permute.xlu1 %154 }
  0x90   :  { %v1487_v19 = vpop.f32.mrf.mxu0 }
  0x92   :  { %607 = vperm.xlu0 %1149, %v565_v18  }
  0x93   :  { %1095 = vmatmul.msk.f32.gmra.mxu0 %vm257_vm0, %v45_v20  ;;  %707 = vperm.xlu1 %1150, %v585_v21  }
  0x94   :  { %602 = vperm.xlu2 %1151, %v564_v27   ;;  %v150_v61 = vpop.permute.xlu0 %149 }
  0x95   :  { %v1577_v62 = vpop.permute.xlu1 %219 }
  0x98   :  { %v1502_v24 = vpop.f32.mrf.mxu0  ;;  %v452_v60 = vpop.f32.mrf.mxu3 }
  0x9a   :  { %702 = vperm.xlu0 %1149, %v584_v23  }
  0x9b   :  { %1096 = vmatmul.msk.f32.gmra.mxu0 %vm257_vm0, %v46_v25  ;;  %597 = vperm.xlu1 %1150, %v563_v26   ;;  %v1602_v26 = vadd.f32 %v452_v60, %v235_v51 }
  0x9c   :  { %697 = vperm.xlu2 %1151, %v583_v32   ;;  %v1581_v2 = vpop.permute.xlu0 %214 }
  0x9d   :  { %v140_v3 = vpop.permute.xlu1 %139 }
  0xa0   :  { %v1517_v29 = vpop.f32.mrf.mxu0  ;;  %v455_v0 = vpop.f32.mrf.mxu3 }
  0xa1   :  { %v1595_v20 = vadd.f32 %v455_v0, %v240_v52 }
  0xa2   :  { %692 = vperm.xlu0 %1149, %v582_v28   ;;  %v130_v28 = vpop.permute.xlu2 %129 }
  0xa3   :  { %1097 = vmatmul.msk.f32.gmra.mxu0 %vm257_vm0, %v47_v30  ;;  %687 = vperm.xlu1 %1150, %v581_v31   ;;  %v495_v27 = vmax.f32 %v1595_v20, 0.0  ;;  %v505_v20 = vld [vmem:[%s2013_s3 + $0x30] sm:$0xff] }
  0xa4   :  { %682 = vperm.xlu2 %1151, %v580_v36   ;;  %v135_v7 = vpop.permute.xlu0 %134 }
  0xa5   :  { %v1583_v10 = vpop.permute.xlu1 %204 }
  0xa8   :  { %v1532_v34 = vpop.f32.mrf.mxu0  ;;  %v458_v5 = vpop.f32.mrf.mxu3 }
  0xa9   :  { %v1589_v16 = vadd.f32 %v458_v5, %v245_v44 }
  0xaa   :  { %677 = vperm.xlu0 %1149, %v579_v33   ;;  %v494_v33 = vmax.f32 %v1602_v26, 0.0  ;;  %v507_v26 = vld [vmem:[%s2013_s3 + $0x40] sm:$0xff] }
  0xab   :  { %1098 = vmatmul.msk.f32.gmra.mxu0 %vm257_vm0, %v48_v35  ;;  %v496_v25 = vmax.f32 %v1589_v16, 0.0  ;;  %v503_v16 = vld [vmem:[%s2013_s3 + $0x20] sm:$0xff] }
  0xac   :  { %v1593_v18 = vpop.permute.xlu0 %199 }
  0xad   :  { %v125_v23 = vpop.permute.xlu1 %124 }
  0xb0   :  { %v1541_v37 = vpop.f32.mrf.mxu0  ;;  %v461_v9 = vpop.f32.mrf.mxu3 }
  0xb1   :  { %v1587_v12 = vadd.f32 %v461_v9, %v250_v43 }
  0xb3   :  { %1099 = vmatmul.msk.f32.gmra.mxu0 %vm257_vm0, %v49_v38  ;;  %v497_v21 = vmax.f32 %v1587_v12, 0.0 }
  0xb4   :  { %v120_v38 = vpop.permute.xlu0 %119 }
  0xb5   :  { %v1612_v43 = vpop.permute.xlu1 %189 }
  0xb8   :  { %v1547_v41 = vpop.f32.mrf.mxu0  ;;  %v464_v15 = vpop.f32.mrf.mxu3 }
  0xb9   :  { %v1591_v17 = vadd.f32 %v464_v15, %v255_v39 }
  0xbb   :  { %1100 = vmatmul.msk.f32.gmra.mxu0 %vm257_vm0, %v50_v42  ;;  %v498_v22 = vmax.f32 %v1591_v17, 0.0  ;;  %v553_v17 = vld [vmem:[%s2013_s3 + $0x1b0] sm:$0xff] }
  0xbd   :  { %868 = vmatpush.msra.mxu2 %v498_v22  ;;  %v110_v60 = vpop.permute.xlu1 %109 }
  0xbf   :  { %869 = vmatpush.msra.mxu2 %v497_v21 }
  0xc0   :  { %v1553_v45 = vpop.f32.mrf.mxu0 }
  0xc1   :  { %870 = vmatpush.msra.mxu2 %v496_v25 }
  0xc3   :  { %1101 = vmatmul.msk.f32.gmra.mxu0 %vm257_vm0, %v51_v46  ;;  %871 = vmatpush.msra.mxu2 %v495_v27 }
  0xc5   :  { %872 = vmatpush.msra.mxu2 %v494_v33  ;;  %v100_v9 = vpop.permute.xlu1 %99 }
  0xc8   :  { %v1559_v49 = vpop.f32.mrf.mxu0 }
  0xcb   :  { %1102 = vmatmul.msk.f32.gmra.mxu0 %vm257_vm0, %v52_v50  ;;  %v1618_v50 = vpop.permute.xlu2 %194 }
  0xd0   :  { %v1565_v53 = vpop.f32.mrf.mxu0 }
  0xd1   :  { %v399_v51 = vadd.f32 %v1565_v53, %v145_v6  ;;  %v390_v53 = vadd.f32 %v1547_v41, %v130_v28 }
  0xd3   :  { %1103 = vmatmul.msk.f32.gmra.mxu0 %vm257_vm0, %v53_v54  ;;  %v396_v54 = vadd.f32 %v1559_v49, %v140_v3  ;;  %v387_v49 = vadd.f32 %v1541_v37, %v125_v23  ;;  %v115_v3 = vpop.permute.xlu2 %114  ;;  %v378_v37 = vadd.f32 %v1502_v24, %v110_v60  ;;  %v499_v24 = vld [vmem:[%s2013_s3] sm:$0xff] }
  0xd4   :  { %v381_v5 = vadd.f32 %v1517_v29, %v115_v3  ;;  %v372_v29 = vadd.f32 %v1472_v14, %v100_v9  ;;  %v506_v9 = vld [vmem:[%s2013_s3 + $0x38] sm:$0xff] }
  0xd5   :  { %v472_v6 = vmax.f32 %v387_v49, 0.0  ;;  %v469_v15 = vmax.f32 %v378_v37, 0.0  ;;  %v523_v37 = vld [vmem:[%s2013_s3 + $0xc0] sm:$0xff] }
  0xd8   :  { %v401_v58 = vpop.f32.mrf.mxu0 }
  0xdb   :  { %1104 = vmatmul.msk.f32.gmra.mxu0 %vm257_vm0, %v54_v59  ;;  %v393_v59 = vadd.f32 %v1553_v45, %v135_v7  ;;  %v473_v45 = vmax.f32 %v390_v53, 0.0 }
  0xdd   :  { %v474_v0 = vmax.f32 %v393_v59, 0.0 }
  0xe0   :  { %v404_v63 = vpop.f32.mrf.mxu0 }
  0xe8   :  { %v407_v4 = vpop.f32.mrf.mxu0 }
  0xe9   :  { %v408_v39 = vadd.f32 %v407_v4, %v160_v57  ;;  %v384_v4 = vadd.f32 %v1532_v34, %v120_v38 }
  0xf0   :  { %v410_v8 = vpop.f32.mrf.mxu0 }
  0xf1   :  { %v411_v35 = vadd.f32 %v410_v8, %v165_v48  ;;  %v479_v48 = vmax.f32 %v408_v39, 0.0  ;;  %v471_v8 = vmax.f32 %v384_v4, 0.0  ;;  %v511_v39 = vld [vmem:[%s2013_s3 + $0x60] sm:$0xff] }
  0xf3   :  { %v480_v44 = vmax.f32 %v411_v35, 0.0  ;;  %v509_v35 = vld [vmem:[%s2013_s3 + $0x50] sm:$0xff] }
  0xf8   :  { %v413_v13 = vpop.f32.mrf.mxu0 }
  0xf9   :  { %v414_v31 = vadd.f32 %v413_v13, %v170_v47  ;;  %v402_v47 = vadd.f32 %v401_v58, %v150_v61  ;;  %v476_v58 = vmax.f32 %v399_v51, 0.0  ;;  %v470_v13 = vmax.f32 %v381_v5, 0.0  ;;  %v502_v5 = vld [vmem:[%s2013_s3 + $0x18] sm:$0xff] }
  0xfb   :  { %v481_v42 = vmax.f32 %v414_v31, 0.0  ;;  %v477_v57 = vmax.f32 %v402_v47, 0.0  ;;  %v501_v31 = vld [vmem:[%s2013_s3 + $0x10] sm:$0xff] }
 0x100   :  { %v416_v30 = vpop.f32.mrf.mxu0 }
 0x101   :  { %v417_v32 = vadd.f32 %v416_v30, %v175_v40  ;;  %v405_v40 = vadd.f32 %v404_v63, %v155_v56  ;;  %v1622_v56 = vpop.permute.xlu0 %184  ;;  %v475_v63 = vmax.f32 %v396_v54, 0.0  ;;  %v467_v30 = vmax.f32 %v372_v29, 0.0  ;;  %v558_v29 = vld [vmem:[%s2013_s3 + $0x1d8] sm:$0xff] }
 0x103   :  { %v482_v36 = vmax.f32 %v417_v32, 0.0  ;;  %v478_v52 = vmax.f32 %v405_v40, 0.0  ;;  %v551_v32 = vld [vmem:[%s2013_s3 + $0x1a0] sm:$0xff] }
 0x105   :  { %755 = vmatpush.msra.mxu1 %v482_v36  ;;  %1115 = vmatpush.msrb.mxu3 %v482_v36  ;;  %v559_v36 = vld [vmem:[%s2013_s3 + $0x1e0] sm:$0xff] }
 0x107   :  { %756 = vmatpush.msra.mxu1 %v481_v42  ;;  %1116 = vmatpush.msrb.mxu3 %v481_v42  ;;  %v561_v42 = vld [vmem:[%s2013_s3 + $0x1f0] sm:$0xff] }
 0x108   :  { %v1616_v46 = vpop.f32.mrf.mxu0 }
 0x109   :  { %757 = vmatpush.msra.mxu1 %v480_v44  ;;  %1117 = vmatpush.msrb.mxu3 %v480_v44  ;;  %v105_v41 = vpop.permute.xlu0 %104 }
 0x10a   :  { %v375_v34 = vadd.f32 %v1487_v19, %v105_v41  ;;  %v549_v19 = vld [vmem:[%s2013_s3 + $0x190] sm:$0xff] }
 0x10b   :  { %758 = vmatpush.msra.mxu1 %v479_v48  ;;  %1118 = vmatpush.msrb.mxu3 %v479_v48  ;;  %v513_v48 = vld [vmem:[%s2013_s3 + $0x70] sm:$0xff] }
 0x10c   :  { %v468_v23 = vmax.f32 %v375_v34, 0.0  ;;  %v521_v41 = vld [vmem:[%s2013_s3 + $0xb0] sm:$0xff] }
 0x10d   :  { %759 = vmatpush.msra.mxu1 %v478_v52  ;;  %1119 = vmatpush.msrb.mxu3 %v478_v52  ;;  %v525_v34 = vld [vmem:[%s2013_s3 + $0xd0] sm:$0xff] }
 0x10f   :  { %760 = vmatpush.msra.mxu1 %v477_v57  ;;  %1120 = vmatpush.msrb.mxu3 %v477_v57 }
 0x110   :  { %v1625_v61 = vpop.f32.mrf.mxu0 }
 0x111   :  { %761 = vmatpush.msra.mxu1 %v476_v58  ;;  %1121 = vmatpush.msrb.mxu3 %v476_v58  ;;  %v423_v49 = vadd.f32 %v1625_v61, %v1622_v56  ;;  %v500_v56 = vld [vmem:[%s2013_s3 + $0x8] sm:$0xff]  ;;  %v550_v61 = vld [vmem:[%s2013_s3 + $0x198] sm:$0xff] }
 0x113   :  { %762 = vmatpush.msra.mxu1 %v475_v63  ;;  %1122 = vmatpush.msrb.mxu3 %v475_v63 }
 0x115   :  { %763 = vmatpush.msra.mxu1 %v474_v0  ;;  %1123 = vmatpush.msrb.mxu3 %v474_v0  ;;  %v517_v0 = vld [vmem:[%s2013_s3 + $0x90] sm:$0xff] }
 0x117   :  { %764 = vmatpush.msra.mxu1 %v473_v45  ;;  %1124 = vmatpush.msrb.mxu3 %v473_v45 }
 0x118   :  { %v1631_v7 = vpop.f32.mrf.mxu0 }
 0x119   :  { %765 = vmatpush.msra.mxu1 %v472_v6  ;;  %1125 = vmatpush.msrb.mxu3 %v472_v6  ;;  %v552_v6 = vld [vmem:[%s2013_s3 + $0x1a8] sm:$0xff] }
 0x11b   :  { %766 = vmatpush.msra.mxu1 %v471_v8  ;;  %1126 = vmatpush.msrb.mxu3 %v471_v8  ;;  %v554_v8 = vld [vmem:[%s2013_s3 + $0x1b8] sm:$0xff] }
 0x11d   :  { %767 = vmatpush.msra.mxu1 %v470_v13  ;;  %1127 = vmatpush.msrb.mxu3 %v470_v13  ;;  %v556_v13 = vld [vmem:[%s2013_s3 + $0x1c8] sm:$0xff] }
 0x11f   :  { %768 = vmatpush.msra.mxu1 %v469_v15  ;;  %1128 = vmatpush.msrb.mxu3 %v469_v15  ;;  %v508_v15 = vld [vmem:[%s2013_s3 + $0x48] sm:$0xff] }
 0x120   :  { %v1636_v28 = vpop.f32.mrf.mxu0 }
 0x121   :  { %769 = vmatpush.msra.mxu1 %v468_v23  ;;  %1129 = vmatpush.msrb.mxu3 %v468_v23  ;;  %v527_v23 = vld [vmem:[%s2013_s3 + $0xe0] sm:$0xff] }
 0x123   :  { %770 = vmatpush.msra.mxu1 %v467_v30  ;;  %1130 = vmatpush.msrb.mxu3 %v467_v30  ;;  %v560_v30 = vld [vmem:[%s2013_s3 + $0x1e8] sm:$0xff] }
 0x124   :  { %771 = vmatmul.f32.vlgmr.msra.gmra.mxu1 %v499_v24  ;;  %846 = vmatmul.f32.vlgmr.msrb.gmra.mxu3 %v549_v19  ;;  %v529_v24 = vld [vmem:[%s2013_s3 + $0xf0] sm:$0xff]  ;;  %v512_v19 = vld [vmem:[%s2013_s3 + $0x68] sm:$0xff] }
 0x125   :  { %1131 = vmatpush.msra.mxu3 %v498_v22  ;;  %v555_v22 = vld [vmem:[%s2013_s3 + $0x1c0] sm:$0xff] }
 0x127   :  { %1132 = vmatpush.msra.mxu3 %v497_v21 }
 0x128   :  { %v431_v14 = vpop.f32.mrf.mxu0 }
 0x129   :  { %1133 = vmatpush.msra.mxu3 %v496_v25  ;;  %v432_v60 = vadd.f32 %v431_v14, %v1593_v18  ;;  %v562_v14 = vld [vmem:[%s2013_s3 + $0x1f8] sm:$0xff] }
 0x12b   :  { %1134 = vmatpush.msra.mxu3 %v495_v27  ;;  %v557_v27 = vld [vmem:[%s2013_s3 + $0x1d0] sm:$0xff]  ;;  %v487_v63 = vmax.f32 %v432_v60, 0.0 }
 0x12c   :  { %774 = vmatmul.f32.gmra.mxu1 %v501_v31  ;;  %849 = vmatmul.f32.gmra.mxu3 %v551_v32  ;;  %v531_v31 = vld [vmem:[%s2013_s3 + $0x100] sm:$0xff]  ;;  %v514_v32 = vld [vmem:[%s2013_s3 + $0x78] sm:$0xff] }
 0x12d   :  { %1135 = vmatpush.msra.mxu3 %v494_v33 }
 0x130   :  { %v434_v12 = vpop.f32.mrf.mxu0 }
 0x134   :  { %777 = vmatmul.f32.gmra.mxu1 %v503_v16  ;;  %852 = vmatmul.f32.gmra.mxu3 %v553_v17  ;;  %v516_v17 = vld [vmem:[%s2013_s3 + $0x88] sm:$0xff] }
 0x138   :  { %v437_v21 = vpop.f32.mrf.mxu0 }
 0x139   :  { %v438_v59 = vadd.f32 %v437_v21, %v1585_v11  ;;  %v429_v11 = vadd.f32 %v1636_v28, %v1618_v50  ;;  %v180_v50 = vpop.permute.xlu2 %179  ;;  %v510_v28 = vld [vmem:[%s2013_s3 + $0x58] sm:$0xff]  ;;  %v535_v21 = vld [vmem:[%s2013_s3 + $0x120] sm:$0xff] }
 0x13a   :  { %v420_v3 = vadd.f32 %v1616_v46, %v180_v50  ;;  %v519_v46 = vld [vmem:[%s2013_s3 + $0xa0] sm:$0xff] }
 0x13b   :  { %v486_v18 = vmax.f32 %v429_v11, 0.0  ;;  %v547_v11 = vld [vmem:[%s2013_s3 + $0x180] sm:$0xff] }
 0x13c   :  { %780 = vmatmul.f32.gmra.mxu1 %v505_v20  ;;  %855 = vmatmul.f32.gmra.mxu3 %v555_v22  ;;  %v483_v45 = vmax.f32 %v420_v3, 0.0  ;;  %v518_v22 = vld [vmem:[%s2013_s3 + $0x98] sm:$0xff]  ;;  %v532_v3 = vld [vmem:[%s2013_s3 + $0x108] sm:$0xff] }
 0x140   :  { %v440_v25 = vpop.f32.mrf.mxu0 }
 0x141   :  { %v441_v54 = vadd.f32 %v440_v25, %v1581_v2  ;;  %v489_v2 = vmax.f32 %v438_v59, 0.0  ;;  %v1782_v16 = vpop.permute.xlu2 %672  ;;  %v537_v25 = vld [vmem:[%s2013_s3 + $0x130] sm:$0xff]  ;;  %v526_v59 = vld [vmem:[%s2013_s3 + $0xd8] sm:$0xff] }
 0x144   :  { %783 = vmatmul.f32.gmra.mxu1 %v507_v26  ;;  %858 = vmatmul.f32.gmra.mxu3 %v557_v27  ;;  %v1798_v26 = vpop.permute.xlu0 %667 }
 0x148   :  { %v443_v33 = vpop.f32.mrf.mxu0 }
 0x149   :  { %v444_v51 = vadd.f32 %v443_v33, %v1577_v62  ;;  %v515_v62 = vld [vmem:[%s2013_s3 + $0x80] sm:$0xff]  ;;  %v1790_v20 = vpop.permute.xlu2 %657  ;;  %v520_v33 = vld [vmem:[%s2013_s3 + $0xa8] sm:$0xff] }
 0x14b   :  { %v491_v58 = vmax.f32 %v444_v51, 0.0 }
 0x14c   :  { %786 = vmatmul.f32.gmra.mxu1 %v509_v35  ;;  %861 = vmatmul.f32.gmra.mxu3 %v559_v36  ;;  %v539_v36 = vld [vmem:[%s2013_s3 + $0x140] sm:$0xff] }
 0x150   :  { %v446_v38 = vpop.f32.mrf.mxu0 }
 0x151   :  { %v447_v44 = vadd.f32 %v446_v38, %v1579_v1  ;;  %v490_v1 = vmax.f32 %v441_v54, 0.0  ;;  %v1800_v27 = vpop.permute.xlu2 %647  ;;  %v1810_v38 = vpop.permute.xlu0 %652 }
 0x153   :  { %v492_v57 = vmax.f32 %v447_v44, 0.0 }
 0x154   :  { %789 = vmatmul.f32.gmra.mxu1 %v511_v39  ;;  %864 = vmatmul.f32.gmra.mxu3 %v561_v42  ;;  %v522_v39 = vld [vmem:[%s2013_s3 + $0xb8] sm:$0xff] }
 0x158   :  { %v449_v40 = vpop.f32.mrf.mxu0 }
 0x159   :  { %v450_v47 = vadd.f32 %v449_v40, %v1570_v55  ;;  %v435_v55 = vadd.f32 %v434_v12, %v1583_v10  ;;  %v426_v10 = vadd.f32 %v1631_v7, %v1612_v43  ;;  %v484_v43 = vmax.f32 %v423_v49, 0.0  ;;  %v504_v7 = vld [vmem:[%s2013_s3 + $0x28] sm:$0xff]  ;;  %v533_v12 = vld [vmem:[%s2013_s3 + $0x110] sm:$0xff]  ;;  %v1815_v42 = vpop.permute.xlu2 %742  ;;  %v1825_v51 = vpop.permute.xlu0 %747  ;;  %v530_v49 = vld [vmem:[%s2013_s3 + $0xf8] sm:$0xff] }
 0x15a   :  { %v541_v40 = vld [vmem:[%s2013_s3 + $0x150] sm:$0xff] }
 0x15b   :  { %v493_v52 = vmax.f32 %v450_v47, 0.0  ;;  %v488_v53 = vmax.f32 %v435_v55, 0.0  ;;  %v485_v4 = vmax.f32 %v426_v10, 0.0  ;;  %v1820_v47 = vpop.permute.xlu1 %662  ;;  %v545_v55 = vld [vmem:[%s2013_s3 + $0x170] sm:$0xff] }
 0x15c   :  { %792 = vmatmul.f32.gmra.mxu1 %v513_v48  ;;  %v524_v48 = vld [vmem:[%s2013_s3 + $0xc8] sm:$0xff] }
 0x15d   :  { %873 = vmatpush.msra.mxu2 %v493_v52  ;;  %1136 = vmatpush.msra.mxu3 %v493_v52  ;;  %v543_v52 = vld [vmem:[%s2013_s3 + $0x160] sm:$0xff] }
 0x15f   :  { %874 = vmatpush.msra.mxu2 %v492_v57  ;;  %1137 = vmatpush.msra.mxu3 %v492_v57 }
 0x161   :  { %875 = vmatpush.msra.mxu2 %v491_v58  ;;  %1138 = vmatpush.msra.mxu3 %v491_v58  ;;  %v1830_v54 = vpop.permute.xlu2 %632 }
 0x163   :  { %876 = vmatpush.msra.mxu2 %v490_v1  ;;  %1139 = vmatpush.msra.mxu3 %v490_v1  ;;  %v1835_v58 = vpop.permute.xlu1 %752  ;;  %v1840_v1 = vpop.permute.xlu0 %637 }
 0x164   :  { %795 = vmatmul.f32.gmra.mxu1 %v515_v62 }
 0x165   :  { %877 = vmatpush.msra.mxu2 %v489_v2  ;;  %1140 = vmatpush.msra.mxu3 %v489_v2  ;;  %v528_v2 = vld [vmem:[%s2013_s3 + $0xe8] sm:$0xff] }
 0x167   :  { %878 = vmatpush.msra.mxu2 %v488_v53  ;;  %1141 = vmatpush.msra.mxu3 %v488_v53 }
 0x169   :  { %879 = vmatpush.msra.mxu2 %v487_v63  ;;  %1142 = vmatpush.msra.mxu3 %v487_v63  ;;  %v1842_v62 = vpop.permute.xlu2 %727 }
 0x16b   :  { %880 = vmatpush.msra.mxu2 %v486_v18  ;;  %1143 = vmatpush.msra.mxu3 %v486_v18  ;;  %v1850_v53 = vpop.permute.xlu1 %642  ;;  %v1852_v10 = vpop.permute.xlu0 %732 }
 0x16c   :  { %798 = vmatmul.f32.gmra.mxu1 %v517_v0 }
 0x16d   :  { %881 = vmatpush.msra.mxu2 %v485_v4  ;;  %1144 = vmatpush.msra.mxu3 %v485_v4 }
 0x16f   :  { %882 = vmatpush.msra.mxu2 %v484_v43  ;;  %1145 = vmatpush.msra.mxu3 %v484_v43 }
 0x171   :  { %883 = vmatpush.msra.mxu2 %v483_v45  ;;  %1146 = vmatpush.msra.mxu3 %v483_v45  ;;  %v618_v63 = vpop.permute.xlu2 %617 }
 0x172   :  { %884 = vmatmul.f32.vlgmr.msra.gmra.mxu2 %v500_v56  ;;  %959 = vmatmul.f32.vlgmr.msra.gmra.mxu3 %v550_v61  ;;  %v534_v61 = vld [vmem:[%s2013_s3 + $0x118] sm:$0xff] }
 0x173   :  { %v1857_v0 = vpop.permute.xlu1 %737  ;;  %v623_v50 = vpop.permute.xlu0 %622 }
 0x174   :  { %801 = vmatmul.f32.gmra.mxu1 %v519_v46 }
 0x179   :  { %v1862_v4 = vpop.permute.xlu2 %712 }
 0x17a   :  { %887 = vmatmul.f32.gmra.mxu2 %v502_v5  ;;  %962 = vmatmul.f32.gmra.mxu3 %v552_v6  ;;  %2018 = vst [vmem:[#allocation6_spill] sm:$0xff] %v1862_v4 }
 0x17b   :  { %v628_v56 = vpop.permute.xlu1 %627  ;;  %v1869_v46 = vpop.permute.xlu0 %717 }
 0x17c   :  { %804 = vmatmul.f32.gmra.mxu1 %v521_v41  ;;  %2019 = vst [vmem:[#allocation7_spill] sm:$0xff] %v1869_v46 }
 0x181   :  { %v603_v5 = vpop.permute.xlu2 %602 }
 0x182   :  { %890 = vmatmul.f32.gmra.mxu2 %v504_v7  ;;  %965 = vmatmul.f32.gmra.mxu3 %v554_v8 }
 0x184   :  { %807 = vmatmul.f32.gmra.mxu1 %v523_v37  ;;  %v536_v37 = vld [vmem:[%s2013_s3 + $0x128] sm:$0xff] }
 0x18a   :  { %893 = vmatmul.f32.gmra.mxu2 %v506_v9  ;;  %968 = vmatmul.f32.gmra.mxu3 %v556_v13  ;;  %v1876_v9 = vpop.permute.xlu1 %722  ;;  %v608_v13 = vpop.permute.xlu0 %607 }
 0x18c   :  { %810 = vmatmul.f32.gmra.mxu1 %v525_v34 }
 0x192   :  { %896 = vmatmul.f32.gmra.mxu2 %v508_v15  ;;  %971 = vmatmul.f32.gmra.mxu3 %v558_v29 }
 0x194   :  { %813 = vmatmul.f32.gmra.mxu1 %v527_v23 }
 0x19a   :  { %899 = vmatmul.f32.gmra.mxu2 %v510_v28  ;;  %974 = vmatmul.f32.gmra.mxu3 %v560_v30  ;;  %v538_v28 = vld [vmem:[%s2013_s3 + $0x138] sm:$0xff] }
 0x19c   :  { %816 = vmatmul.f32.gmra.mxu1 %v529_v24  ;;  %v613_v24 = vpop.permute.xlu1 %612 }
 0x1a1   :  { %v1805_v35 = vpop.f32.mrf.mxu1 }
 0x1a2   :  { %902 = vmatmul.f32.gmra.mxu2 %v512_v19  ;;  %977 = vmatmul.f32.gmra.mxu3 %v562_v14 }
 0x1a4   :  { %819 = vmatmul.f32.gmra.mxu1 %v531_v31 }
 0x1a7   :  { %v1883_v30 = vpop.f32.mrf.mxu3 }
 0x1a9   :  { %v775_v44 = vpop.f32.mrf.mxu1 }
 0x1aa   :  { %905 = vmatmul.f32.gmra.mxu2 %v514_v32  ;;  %v776_v6 = vadd.f32 %v775_v44, %v603_v5  ;;  %v540_v32 = vld [vmem:[%s2013_s3 + $0x148] sm:$0xff] }
 0x1ac   :  { %822 = vmatmul.f32.gmra.mxu1 %v533_v12 }
 0x1b1   :  { %v778_v57 = vpop.f32.mrf.mxu1 }
 0x1b2   :  { %908 = vmatmul.f32.gmra.mxu2 %v516_v17  ;;  %v779_v34 = vadd.f32 %v778_v57, %v608_v13  ;;  %v1890_v17 = vpop.f32.mrf.mxu3 }
 0x1b4   :  { %825 = vmatmul.f32.gmra.mxu1 %v535_v21 }
 0x1b9   :  { %v781_v60 = vpop.f32.mrf.mxu1 }
 0x1ba   :  { %911 = vmatmul.f32.gmra.mxu2 %v518_v22  ;;  %v782_v19 = vadd.f32 %v781_v60, %v613_v24 }
 0x1bc   :  { %828 = vmatmul.f32.gmra.mxu1 %v537_v25 }
 0x1c1   :  { %v784_v18 = vpop.f32.mrf.mxu1 }
 0x1c2   :  { %914 = vmatmul.f32.gmra.mxu2 %v520_v33  ;;  %v785_v21 = vadd.f32 %v784_v18, %v618_v63  ;;  %v542_v33 = vld [vmem:[%s2013_s3 + $0x158] sm:$0xff] }
 0x1c4   :  { %831 = vmatmul.f32.gmra.mxu1 %v539_v36 }
 0x1c9   :  { %v787_v43 = vpop.f32.mrf.mxu1 }
 0x1ca   :  { %917 = vmatmul.f32.gmra.mxu2 %v522_v39  ;;  %v1899_v39 = vpop.f32.mrf.mxu3 }
 0x1cc   :  { %834 = vmatmul.f32.gmra.mxu1 %v541_v40  ;;  %v788_v40 = vadd.f32 %v787_v43, %v623_v50 }
 0x1d1   :  { %v790_v41 = vpop.f32.mrf.mxu1 }
 0x1d2   :  { %920 = vmatmul.f32.gmra.mxu2 %v524_v48  ;;  %v791_v57 = vadd.f32 %v790_v41, %v628_v56  ;;  %v1906_v60 = vpop.f32.mrf.mxu3 }
 0x1d4   :  { %837 = vmatmul.f32.gmra.mxu1 %v543_v52  ;;  %v544_v52 = vld [vmem:[%s2013_s3 + $0x168] sm:$0xff] }
 0x1d9   :  { %v793_v23 = vpop.f32.mrf.mxu1 }
 0x1da   :  { %923 = vmatmul.f32.gmra.mxu2 %v526_v59  ;;  %v794_v63 = vadd.f32 %v793_v23, %v1830_v54  ;;  %v1919_v43 = vpop.f32.mrf.mxu3 }
 0x1dc   :  { %840 = vmatmul.f32.gmra.mxu1 %v545_v55 }
 0x1e1   :  { %v796_v12 = vpop.f32.mrf.mxu1 }
 0x1e2   :  { %926 = vmatmul.f32.gmra.mxu2 %v528_v2  ;;  %v797_v56 = vadd.f32 %v796_v12, %v1840_v1  ;;  %v1924_v41 = vpop.f32.mrf.mxu3 }
 0x1e4   :  { %843 = vmatmul.f32.gmra.mxu1 %v547_v11  ;;  %v546_v11 = vld [vmem:[%s2013_s3 + $0x178] sm:$0xff] }
 0x1e9   :  { %v1897_v36 = vpop.f32.mrf.mxu1 }
 0x1ea   :  { %929 = vmatmul.f32.gmra.mxu2 %v530_v49 }
 0x1f1   :  { %v802_v59 = vpop.f32.mrf.mxu1 }
 0x1f2   :  { %932 = vmatmul.f32.gmra.mxu2 %v532_v3  ;;  %v548_v3 = vld [vmem:[%s2013_s3 + $0x188] sm:$0xff] }
 0x1f5   :  { %v1864_v45 = vpop.f32.mrf.mxu2 }
 0x1f9   :  { %v805_v50 = vpop.f32.mrf.mxu1 }
 0x1fa   :  { %935 = vmatmul.f32.gmra.mxu2 %v534_v61 }
 0x1fd   :  { %v888_v7 = vpop.f32.mrf.mxu2 }
 0x1fe   :  { %v1871_v8 = vadd.f32 %v888_v7, %v776_v6 }
 0x201   :  { %v808_v6 = vpop.f32.mrf.mxu1 }
 0x202   :  { %938 = vmatmul.f32.gmra.mxu2 %v536_v37  ;;  %v1926_v37 = vpop.f32.mrf.mxu3 }
 0x205   :  { %v891_v15 = vpop.f32.mrf.mxu2 }
 0x206   :  { %v1878_v29 = vadd.f32 %v891_v15, %v779_v34 }
 0x209   :  { %v811_v7 = vpop.f32.mrf.mxu1 }
 0x20a   :  { %941 = vmatmul.f32.gmra.mxu2 %v538_v28  ;;  %v1928_v34 = vpop.f32.mrf.mxu3 }
 0x20d   :  { %v894_v14 = vpop.f32.mrf.mxu2 }
 0x20e   :  { %v1885_v31 = vadd.f32 %v894_v14, %v782_v19  ;;  %v1932_v14 = vpop.permute.xlu0 %702 }
 0x20f   :  { %2020 = vst [vmem:[#allocation8_spill] sm:$0xff] %v1932_v14 }
 0x211   :  { %v814_v15 = vpop.f32.mrf.mxu1 }
 0x212   :  { %944 = vmatmul.f32.gmra.mxu2 %v540_v32  ;;  %v1930_v24 = vpop.f32.mrf.mxu3 }
 0x215   :  { %v897_v22 = vpop.f32.mrf.mxu2 }
 0x216   :  { %v1892_v25 = vadd.f32 %v897_v22, %v785_v21  ;;  %v1936_v22 = vpop.permute.xlu0 %692 }
 0x217   :  { %2021 = vst [vmem:[#allocation9_spill] sm:$0xff] %v1936_v22  ;;  %v806_v22 = vadd.f32 %v805_v50, %v1810_v38 }
 0x219   :  { %v817_v19 = vpop.f32.mrf.mxu1 }
 0x21a   :  { %947 = vmatmul.f32.gmra.mxu2 %v542_v33  ;;  %v1934_v32 = vpop.f32.mrf.mxu3 }
 0x21d   :  { %v900_v44 = vpop.f32.mrf.mxu2 }
 0x21e   :  { %v1901_v48 = vadd.f32 %v900_v44, %v788_v40  ;;  %v815_v44 = vadd.f32 %v814_v15, %v1798_v26  ;;  %v678_v4 = vpop.permute.xlu0 %677  ;;  %v803_v26 = vadd.f32 %v802_v59, %v1800_v27 }
 0x221   :  { %v820_v12 = vpop.f32.mrf.mxu1 }
 0x222   :  { %950 = vmatmul.f32.gmra.mxu2 %v544_v52  ;;  %v1938_v33 = vpop.f32.mrf.mxu3  ;;  %v818_v52 = vadd.f32 %v817_v19, %v1782_v16  ;;  %v821_v15 = vadd.f32 %v820_v12, %v678_v4 }
 0x225   :  { %v903_v55 = vpop.f32.mrf.mxu2 }
 0x226   :  { %v1908_v2 = vadd.f32 %v903_v55, %v791_v57  ;;  %v812_v55 = vadd.f32 %v811_v7, %v1820_v47 }
 0x229   :  { %v823_v40 = vpop.f32.mrf.mxu1 }
 0x22a   :  { %953 = vmatmul.f32.gmra.mxu2 %v546_v11  ;;  %v972_v16 = vpop.f32.mrf.mxu3 }
 0x22d   :  { %v906_v49 = vpop.f32.mrf.mxu2 }
 0x22e   :  { %v1914_v18 = vadd.f32 %v906_v49, %v794_v63  ;;  %v809_v49 = vadd.f32 %v808_v6, %v1790_v20  ;;  %v800_v6 = vadd.f32 %v1897_v36, %v1850_v53 }
 0x231   :  { %v1948_v7 = vpop.f32.mrf.mxu1 }
 0x232   :  { %956 = vmatmul.f32.gmra.mxu2 %v548_v3 }
 0x235   :  { %v909_v61 = vpop.f32.mrf.mxu2 }
 0x236   :  { %v1922_v5 = vadd.f32 %v909_v61, %v797_v56  ;;  %v1944_v61 = vpop.permute.xlu2 %697 }
 0x238   :  { %v989_v53 = vmax.f32 %v1922_v5, 0.0 }
 0x23d   :  { %v912_v54 = vpop.f32.mrf.mxu2 }
 0x23e   :  { %v913_v50 = vadd.f32 %v912_v54, %v800_v6  ;;  %v683_v4 = vpop.permute.xlu2 %682  ;;  %v988_v54 = vmax.f32 %v1914_v18, 0.0  ;;  %v866_v18 = vadd.f32 %v1926_v37, %v1835_v58  ;;  %v857_v58 = vadd.f32 %v1906_v60, %v1857_v0 }
 0x23f   :  { %v824_v59 = vadd.f32 %v823_v40, %v683_v4  ;;  %v986_v40 = vmax.f32 %v1901_v48, 0.0  ;;  %v983_v48 = vmax.f32 %v1878_v29, 0.0  ;;  %v848_v0 = vadd.f32 %v1883_v30, %v1876_v9  ;;  %v1013_v9 = vld [vmem:[%s2015_s5] sm:$0x3] }
 0x240   :  { %v1017_v30 = vperm.slane %v1013_v9, 0 }
 0x245   :  { %v915_v13 = vpop.f32.mrf.mxu2 }
 0x24d   :  { %v918_v23 = vpop.f32.mrf.mxu2 }
 0x24e   :  { %v919_v19 = vadd.f32 %v918_v23, %v806_v22  ;;  %v990_v23 = vmax.f32 %v913_v50, 0.0  ;;  %v975_v22 = vpop.f32.mrf.mxu3 }
 0x255   :  { %v921_v28 = vpop.f32.mrf.mxu2 }
 0x256   :  { %v922_v14 = vadd.f32 %v921_v28, %v809_v49  ;;  %v992_v28 = vmax.f32 %v919_v19, 0.0 }
 0x25d   :  { %v924_v1 = vpop.f32.mrf.mxu2 }
 0x25e   :  { %v925_v3 = vadd.f32 %v924_v1, %v812_v55  ;;  %v916_v1 = vadd.f32 %v915_v13, %v803_v26  ;;  %v1959_v13 = vpop.f32.mrf.mxu1  ;;  %v984_v55 = vmax.f32 %v1885_v31, 0.0 }
 0x260   :  { %v994_v47 = vmax.f32 %v925_v3, 0.0  ;;  %v991_v27 = vmax.f32 %v916_v1, 0.0  ;;  %v982_v3 = vmax.f32 %v1871_v8, 0.0 }
 0x265   :  { %v927_v21 = vpop.f32.mrf.mxu2 }
 0x266   :  { %v928_v11 = vadd.f32 %v927_v21, %v815_v44  ;;  %v993_v21 = vmax.f32 %v922_v14, 0.0  ;;  %v987_v14 = vmax.f32 %v1908_v2, 0.0  ;;  %v832_v2 = vpop.f32.mrf.mxu1 }
 0x268   :  { %v995_v46 = vmax.f32 %v928_v11, 0.0  ;;  %v978_v11 = vpop.f32.mrf.mxu3 }
 0x269   :  { %v979_v49 = vadd.f32 %v978_v11, %v866_v18 }
 0x26b   :  { %v1012_v29 = vmax.f32 %v979_v49, 0.0 }
 0x26d   :  { %v930_v57 = vpop.f32.mrf.mxu2 }
 0x26e   :  { %v931_v63 = vadd.f32 %v930_v57, %v818_v52  ;;  %v985_v52 = vmax.f32 %v1892_v25, 0.0  ;;  %v863_v25 = vadd.f32 %v1924_v41, %v1825_v51  ;;  %v854_v51 = vadd.f32 %v1899_v39, %v1852_v10 }
 0x26f   :  { %v970_v41 = vadd.f32 %v1938_v33, %v857_v58  ;;  %v961_v10 = vadd.f32 %v1928_v34, %v848_v0  ;;  %v2022_v34 = vld [vmem:[#allocation6_spill] sm:$0xff] }
 0x270   :  { %v996_v56 = vmax.f32 %v931_v63, 0.0  ;;  %v976_v31 = vadd.f32 %v975_v22, %v863_v25 }
 0x272   :  { %1021 = vmatpush.msrb.mxu3 %v996_v56  ;;  %v1011_v8 = vmax.f32 %v976_v31, 0.0 }
 0x274   :  { %1022 = vmatpush.msrb.mxu3 %v995_v46  ;;  %v1954_v46 = vpop.permute.xlu1 %707 }
 0x275   :  { %v933_v20 = vpop.f32.mrf.mxu2 }
 0x276   :  { %v1952_v38 = vadd.f32 %v933_v20, %v821_v15  ;;  %1023 = vmatpush.msrb.mxu3 %v994_v47  ;;  %v835_v15 = vpop.f32.mrf.mxu1 }
 0x278   :  { %1024 = vmatpush.msrb.mxu3 %v993_v21  ;;  %v2023_v21 = vld [vmem:[#allocation7_spill] sm:$0xff] }
 0x27a   :  { %1025 = vmatpush.msrb.mxu3 %v992_v28 }
 0x27c   :  { %1026 = vmatpush.msrb.mxu3 %v991_v27  ;;  %v598_v5 = vpop.permute.xlu1 %597 }
 0x27d   :  { %v936_v12 = vpop.f32.mrf.mxu2  ;;  %v773_v57 = vadd.f32 %v1805_v35, %v598_v5  ;;  %v860_v35 = vadd.f32 %v1919_v43, %v1815_v42  ;;  %v851_v42 = vadd.f32 %v1890_v17, %v1842_v62  ;;  %v967_v43 = vadd.f32 %v1934_v32, %v854_v51 }
 0x27e   :  { %v1957_v36 = vadd.f32 %v936_v12, %v824_v59  ;;  %1027 = vmatpush.msrb.mxu3 %v990_v23  ;;  %v1006_v62 = vmax.f32 %v961_v10, 0.0  ;;  %v838_v17 = vpop.f32.mrf.mxu1  ;;  %v2024_v23 = vld [vmem:[#allocation8_spill] sm:$0xff] }
 0x27f   :  { %v886_v63 = vadd.f32 %v1864_v45, %v773_v57  ;;  %v973_v45 = vadd.f32 %v972_v16, %v860_v35  ;;  %v964_v60 = vadd.f32 %v1930_v24, %v851_v42  ;;  %v1009_v16 = vmax.f32 %v970_v41, 0.0 }
 0x280   :  { %1028 = vmatpush.msrb.mxu3 %v989_v53  ;;  %v1008_v39 = vmax.f32 %v967_v43, 0.0  ;;  %v839_v27 = vadd.f32 %v838_v17, %v1954_v46  ;;  %v836_v12 = vadd.f32 %v835_v15, %v2024_v23  ;;  %v998_v49 = vmax.f32 %v1957_v36, 0.0 }
 0x281   :  { %v981_v26 = vmax.f32 %v886_v63, 0.0  ;;  %v1010_v37 = vmax.f32 %v973_v45, 0.0  ;;  %v1007_v33 = vmax.f32 %v964_v60, 0.0 }
 0x282   :  { %1029 = vmatpush.msrb.mxu3 %v988_v54  ;;  %v833_v54 = vadd.f32 %v832_v2, %v1944_v61 }
 0x284   :  { %1030 = vmatpush.msrb.mxu3 %v987_v14  ;;  %v688_v11 = vpop.permute.xlu1 %687 }
 0x285   :  { %v1964_v44 = vpop.f32.mrf.mxu2  ;;  %v827_v46 = vadd.f32 %v1948_v7, %v688_v11 }
 0x286   :  { %1031 = vmatpush.msrb.mxu3 %v986_v40  ;;  %v841_v47 = vpop.f32.mrf.mxu1 }
 0x287   :  { %v842_v1 = vadd.f32 %v841_v47, %v2022_v34 }
 0x288   :  { %1032 = vmatpush.msrb.mxu3 %v985_v52  ;;  %v2025_v52 = vld [vmem:[#allocation9_spill] sm:$0xff] }
 0x289   :  { %v830_v5 = vadd.f32 %v1959_v13, %v2025_v52  ;;  %v1018_v13 = vperm.slane %v1013_v9, 1 }
 0x28a   :  { %1033 = vmatpush.msrb.mxu3 %v984_v55 }
 0x28c   :  { %1034 = vmatpush.msrb.mxu3 %v983_v48  ;;  %v940_v48 = vadd.f32 %v1964_v44, %v827_v46  ;;  %v1015_v44 = vstv %s2016_s6 }
 0x28d   :  { %v942_v56 = vpop.f32.mrf.mxu2 }
 0x28e   :  { %1035 = vmatpush.msrb.mxu3 %v982_v3  ;;  %v844_v6 = vpop.f32.mrf.mxu1  ;;  %v943_v18 = vadd.f32 %v942_v56, %v830_v5  ;;  %v999_v2 = vmax.f32 %v940_v48, 0.0  ;;  %v997_v3 = vmax.f32 %v1952_v38, 0.0 }
 0x28f   :  { %v845_v50 = vadd.f32 %v844_v6, %v2023_v21 }
 0x290   :  { %1036 = vmatpush.msrb.mxu3 %v981_v26  ;;  %v1000_v61 = vmax.f32 %v943_v18, 0.0 }
 0x291   :  { %1037 = vmatmul.f32.vlgmr.msrb.gmra.mxu3 %v1017_v30 }
 0x292   :  { %1041 = vmatpush.msra.mxu3 %v1012_v29 }
 0x294   :  { %1042 = vmatpush.msra.mxu3 %v1011_v8 }
 0x295   :  { %v945_v19 = vpop.f32.mrf.mxu2 }
 0x296   :  { %1043 = vmatpush.msra.mxu3 %v1010_v37  ;;  %v946_v57 = vadd.f32 %v945_v19, %v833_v54 }
 0x298   :  { %1044 = vmatpush.msra.mxu3 %v1009_v16  ;;  %v1001_v25 = vmax.f32 %v946_v57, 0.0 }
 0x29a   :  { %1045 = vmatpush.msra.mxu3 %v1008_v39 }
 0x29c   :  { %1046 = vmatpush.msra.mxu3 %v1007_v33 }
 0x29d   :  { %v948_v32 = vpop.f32.mrf.mxu2 }
 0x29e   :  { %1047 = vmatpush.msra.mxu3 %v1006_v62  ;;  %v949_v14 = vadd.f32 %v948_v32, %v836_v12 }
 0x2a0   :  { %v1002_v63 = vmax.f32 %v949_v14, 0.0 }
 0x2a5   :  { %v951_v24 = vpop.f32.mrf.mxu2 }
 0x2a6   :  { %v952_v22 = vadd.f32 %v951_v24, %v839_v27 }
 0x2a8   :  { %v1003_v55 = vmax.f32 %v952_v22, 0.0 }
 0x2ad   :  { %v954_v20 = vpop.f32.mrf.mxu2 }
 0x2ae   :  { %v955_v4 = vadd.f32 %v954_v20, %v842_v1 }
 0x2b0   :  { %v1004_v40 = vmax.f32 %v955_v4, 0.0 }
 0x2b5   :  { %v957_v28 = vpop.f32.mrf.mxu2 }
 0x2b6   :  { %v958_v59 = vadd.f32 %v957_v28, %v845_v50 }
 0x2b8   :  { %v1005_v53 = vmax.f32 %v958_v59, 0.0 }
 0x2ba   :  { %1048 = vmatpush.msra.mxu3 %v1005_v53 }
 0x2bc   :  { %1049 = vmatpush.msra.mxu3 %v1004_v40 }
 0x2be   :  { %1050 = vmatpush.msra.mxu3 %v1003_v55 }
 0x2c0   :  { %1051 = vmatpush.msra.mxu3 %v1002_v63 }
 0x2c2   :  { %1052 = vmatpush.msra.mxu3 %v1001_v25 }
 0x2c4   :  { %1053 = vmatpush.msra.mxu3 %v1000_v61 }
 0x2c6   :  { %1054 = vmatpush.msra.mxu3 %v999_v2 }
 0x2c8   :  { %1055 = vmatpush.msra.mxu3 %v998_v49 }
 0x2ca   :  { %1056 = vmatpush.msra.mxu3 %v997_v3 }
 0x2cb   :  { %1057 = vmatmul.f32.vlgmr.msra.gmra.mxu3 %v1018_v13 }
 0x314   :  { %v1038_v7 = vpop.f32.mrf.mxu3 }
 0x315   :  { %v1039_v35 = vadd.f32 %v1038_v7, %v1015_v44 }
 0x34e   :  { %v1058_v36 = vpop.f32.mrf.mxu3 }
 0x34f   :  { %v1059_v31 = vadd.f32 %v1058_v36, %v1039_v35 }
 0x351   :  { %1061 = vst [vmem:[#allocation3] sm:$0x1] %v1059_v31 }
 0x352   :  { %1072 = dma.vmem_to_hbm [thread:$0]  %s1068_s25, 16, %s1070_s27, [#allocation4]  }
 0x353   :  { %1176 = dma.done.wait [#allocation4], 16  }
 0x354   :  { %1177 = vsyncadd [#allocation4], 4294967280 }
 0x355   :  { %1077 = vsyncpa [#allocation4], 1 }

</bundles_post_ra>
